<compile_context>
chip_gen: v5e
topology: v5e:2x2
jax: 0.10.0
libtpu: 0.0.40
codegen_flags: <defaults>
</compile_context>

<pallas_src>
import jax
import jax.numpy as jnp
from jax.experimental import pallas as pl
from jax.experimental.pallas import tpu as pltpu

N_MELS = 80
HIDDEN = 128
VOCAB = 28
OUT_DIM = VOCAB + 1   # 29

_PREC = jax.lax.Precision.HIGHEST


def _acoustic_kernel(x_ref, w1_ref, b1_ref, w2_ref, b2_ref, o_ref):
    # x_ref:  (tm, N_MELS)
    # w1_ref: (N_MELS, HIDDEN), b1_ref: (1, HIDDEN)
    # w2_ref: (HIDDEN, OUT_DIM), b2_ref: (1, OUT_DIM)
    # o_ref:  (tm, OUT_DIM)
    h = jnp.dot(x_ref[...], w1_ref[...],
                preferred_element_type=jnp.float32, precision=_PREC)
    h = jnp.maximum(h + b1_ref[...], 0.0)  # ReLU
    y = jnp.dot(h, w2_ref[...],
                preferred_element_type=jnp.float32, precision=_PREC)
    o_ref[...] = (y + b2_ref[...]).astype(o_ref.dtype)


def _round_up(x, m):
    return ((x + m - 1) // m) * m


def _choose_tm(M, *, target=4096, min_parallel_steps=1):
    """Largest row tile up to `target` (multiple of 8).

    `min_parallel_steps` should be left at 1 for v5e/v6e (single TensorCore);
    pass 2 on v7x so the "parallel" grid axis has work for both TensorCores.
    """
    tm = min(target, _round_up(max(M, 1), 8))
    if min_parallel_steps > 1 and M > 8 * min_parallel_steps:
        cap = _round_up(-(-M // min_parallel_steps), 8)
        tm = min(tm, cap)
    return max(8, tm)


def acoustic_model_forward(x, w1, b1, w2, b2, *, tm=None, min_parallel_steps=1):
    """x: [B, T, N_MELS] float32 -> [B, T, OUT_DIM] float32."""
    B, T, F = x.shape
    assert F == N_MELS
    M = B * T
    if tm is None:
        tm = _choose_tm(M, min_parallel_steps=min_parallel_steps)
    grid_m = -(-M // tm)  # cdiv; ragged last block masked by Pallas

    x2 = x.reshape(M, F)  # contiguous view, no data movement

    out = pl.pallas_call(
        _acoustic_kernel,
        out_shape=jax.ShapeDtypeStruct((M, OUT_DIM), jnp.float32),
        grid_spec=pltpu.PrefetchScalarGridSpec(
            num_scalar_prefetch=0,
            grid=(grid_m,),
            in_specs=[
                pl.BlockSpec((tm, N_MELS), lambda i: (i, 0)),
                pl.BlockSpec((N_MELS, HIDDEN), lambda i: (0, 0)),
                pl.BlockSpec((1, HIDDEN), lambda i: (0, 0)),
                pl.BlockSpec((HIDDEN, OUT_DIM), lambda i: (0, 0)),
                pl.BlockSpec((1, OUT_DIM), lambda i: (0, 0)),
            ],
            out_specs=pl.BlockSpec((tm, OUT_DIM), lambda i: (i, 0)),
        ),
        compiler_params=pltpu.CompilerParams(
            dimension_semantics=("parallel",),
            vmem_limit_bytes=32 * 1024 * 1024,
        ),
    )(x2, w1, b1, w2, b2)

    return out.reshape(B, T, OUT_DIM)


def init_params(key):
    """Deterministic init mimicking nn.Linear default (uniform ±1/sqrt(fan_in))."""
    k1, k2, k3, k4 = jax.random.split(key, 4)
    bound1 = 1.0 / (N_MELS ** 0.5)
    bound2 = 1.0 / (HIDDEN ** 0.5)
    w1 = jax.random.uniform(k1, (N_MELS, HIDDEN), jnp.float32, -bound1, bound1)
    b1 = jax.random.uniform(k2, (1, HIDDEN), jnp.float32, -bound1, bound1)
    w2 = jax.random.uniform(k3, (HIDDEN, OUT_DIM), jnp.float32, -bound2, bound2)
    b2 = jax.random.uniform(k4, (1, OUT_DIM), jnp.float32, -bound2, bound2)
    return w1, b1, w2, b2


def _reference(x, w1, b1, w2, b2):
    h = jnp.maximum(jnp.dot(x, w1, precision=_PREC) + b1[0], 0.0)
    return jnp.dot(h, w2, precision=_PREC) + b2[0]


if __name__ == "__main__":
    key = jax.random.PRNGKey(0)
    k_x, k_x2, k_p = jax.random.split(key, 3)

    w1, b1, w2, b2 = init_params(k_p)

    # Main test: small shapes consistent with the module.
    B, T = 2, 8
    x = jax.random.normal(k_x, (B, T, N_MELS), jnp.float32)
    y = jax.block_until_ready(acoustic_model_forward(x, w1, b1, w2, b2))
    y_ref = _reference(x, w1, b1, w2, b2)
    assert y.shape == (B, T, OUT_DIM)
    assert jnp.allclose(y, y_ref, atol=1e-5, rtol=1e-5)

    # Ragged test: B*T not a multiple of 8 — exercises the masked last-block
    # path (rows beyond M are read as garbage but never written back).
    B2, T2 = 3, 5
    xr = jax.random.normal(k_x2, (B2, T2, N_MELS), jnp.float32)
    yr = jax.block_until_ready(acoustic_model_forward(xr, w1, b1, w2, b2))
    yr_ref = _reference(xr, w1, b1, w2, b2)
    assert yr.shape == (B2, T2, OUT_DIM)
    assert jnp.allclose(yr, yr_ref, atol=1e-5, rtol=1e-5)

    print("KERNEL_OK")
</pallas_src>

<mosaic_0001>
module attributes {stable_mosaic.version = 11 : i64} {
  func.func @_acoustic_kernel(%arg0: i32, %arg1: memref<16x80xf32, #tpu.memory_space<vmem>>, %arg2: memref<80x128xf32, #tpu.memory_space<vmem>>, %arg3: memref<1x128xf32, #tpu.memory_space<vmem>>, %arg4: memref<128x29xf32, #tpu.memory_space<vmem>>, %arg5: memref<1x29xf32, #tpu.memory_space<vmem>>, %arg6: memref<16x29xf32, #tpu.memory_space<vmem>>) attributes {dimension_semantics = [#tpu.dimension_semantics<parallel>], iteration_bounds = array<i64: 1>, scalar_prefetch = 0 : i64, scratch_operands = 0 : i64, tpu.core_type = #tpu.core_type<tc>, window_params = [{transform_indices = @transform_0, window_bounds = array<i64: 16, 80>}, {pipeline_mode = #tpu.pipeline_mode<synchronous>, transform_indices = @transform_1, window_bounds = array<i64: 80, 128>}, {pipeline_mode = #tpu.pipeline_mode<synchronous>, transform_indices = @transform_2, window_bounds = array<i64: 1, 128>}, {pipeline_mode = #tpu.pipeline_mode<synchronous>, transform_indices = @transform_3, window_bounds = array<i64: 128, 29>}, {pipeline_mode = #tpu.pipeline_mode<synchronous>, transform_indices = @transform_4, window_bounds = array<i64: 1, 29>}, {transform_indices = @transform_5, window_bounds = array<i64: 16, 29>}]} {
    %c0 = arith.constant 0 : index
    %c0_0 = arith.constant 0 : index
    %0 = vector.load %arg1[%c0, %c0_0] : memref<16x80xf32, #tpu.memory_space<vmem>>, vector<16x80xf32>
    %c0_1 = arith.constant 0 : index
    %c0_2 = arith.constant 0 : index
    %1 = vector.load %arg2[%c0_1, %c0_2] : memref<80x128xf32, #tpu.memory_space<vmem>>, vector<80x128xf32>
    %cst = arith.constant dense<0.000000e+00> : vector<16x128xf32>
    %2 = tpu.matmul %0, %1, %cst {dimension_numbers = #tpu.dot_dimension_numbers<[1], [0], [0], [1], [0, 0, 1, 1], [], []>, precision = #tpu.contract_precision<fp32>} : vector<16x80xf32>, vector<80x128xf32>, vector<16x128xf32> -> vector<16x128xf32>
    %c0_3 = arith.constant 0 : index
    %c0_4 = arith.constant 0 : index
    %3 = vector.load %arg3[%c0_3, %c0_4] : memref<1x128xf32, #tpu.memory_space<vmem>>, vector<1x128xf32>
    %4 = vector.broadcast %3 : vector<1x128xf32> to vector<16x128xf32>
    %5 = arith.addf %2, %4 : vector<16x128xf32>
    %cst_5 = arith.constant 0.000000e+00 : f32
    %6 = vector.broadcast %cst_5 : f32 to vector<16x128xf32>
    %7 = arith.maximumf %5, %6 : vector<16x128xf32>
    %c0_6 = arith.constant 0 : index
    %c0_7 = arith.constant 0 : index
    %8 = vector.load %arg4[%c0_6, %c0_7] : memref<128x29xf32, #tpu.memory_space<vmem>>, vector<128x29xf32>
    %cst_8 = arith.constant dense<0.000000e+00> : vector<16x29xf32>
    %9 = tpu.matmul %7, %8, %cst_8 {dimension_numbers = #tpu.dot_dimension_numbers<[1], [0], [0], [1], [0, 0, 1, 1], [], []>, precision = #tpu.contract_precision<fp32>} : vector<16x128xf32>, vector<128x29xf32>, vector<16x29xf32> -> vector<16x29xf32>
    %c0_9 = arith.constant 0 : index
    %c0_10 = arith.constant 0 : index
    %10 = vector.load %arg5[%c0_9, %c0_10] : memref<1x29xf32, #tpu.memory_space<vmem>>, vector<1x29xf32>
    %11 = vector.broadcast %10 : vector<1x29xf32> to vector<16x29xf32>
    %12 = arith.addf %9, %11 : vector<16x29xf32>
    %c0_11 = arith.constant 0 : index
    %c0_12 = arith.constant 0 : index
    %13 = vector.load %arg6[%c0_11, %c0_12] : memref<16x29xf32, #tpu.memory_space<vmem>>, vector<16x29xf32>
    tpu.vector_store %arg6[%c0_11, %c0_12], %12 {strides = array<i32>} : memref<16x29xf32, #tpu.memory_space<vmem>>, vector<16x29xf32>,
    return
  }
  func.func @transform_0(%arg0: i32) -> (i32, i32) {
    %c0_i32 = arith.constant 0 : i32
    %c0_i32_0 = arith.constant 0 : i32
    return %arg0, %c0_i32 : i32, i32
  }
  func.func @transform_1(%arg0: i32) -> (i32, i32) {
    %c0_i32 = arith.constant 0 : i32
    %c0_i32_0 = arith.constant 0 : i32
    %c0_i32_1 = arith.constant 0 : i32
    return %c0_i32, %c0_i32_0 : i32, i32
  }
  func.func @transform_2(%arg0: i32) -> (i32, i32) {
    %c0_i32 = arith.constant 0 : i32
    %c0_i32_0 = arith.constant 0 : i32
    %c0_i32_1 = arith.constant 0 : i32
    return %c0_i32, %c0_i32_0 : i32, i32
  }
  func.func @transform_3(%arg0: i32) -> (i32, i32) {
    %c0_i32 = arith.constant 0 : i32
    %c0_i32_0 = arith.constant 0 : i32
    %c0_i32_1 = arith.constant 0 : i32
    return %c0_i32, %c0_i32_0 : i32, i32
  }
  func.func @transform_4(%arg0: i32) -> (i32, i32) {
    %c0_i32 = arith.constant 0 : i32
    %c0_i32_0 = arith.constant 0 : i32
    %c0_i32_1 = arith.constant 0 : i32
    return %c0_i32, %c0_i32_0 : i32, i32
  }
  func.func @transform_5(%arg0: i32) -> (i32, i32) {
    %c0_i32 = arith.constant 0 : i32
    %c0_i32_0 = arith.constant 0 : i32
    return %arg0, %c0_i32 : i32, i32
  }
}

</mosaic_0001>

<bundles_post_ra>
// kernel: tpu_custom_call.1
= control target key start
LH: loop header
LB: loop body
LE: loop exit
PB: predicated region body
PF: predicated region fallthrough
CT: control target
= control target key end

     0   :  { %s1292_s0 = inlined_call_operand.vmem [shape: f32[16,80], index: 0, kind: input, shape index: {}]   ;;  %s1293_s1 = inlined_call_operand.vmem [shape: f32[80,128], index: 1, kind: input, shape index: {}]   ;;  %s1294_s2 = inlined_call_operand.vmem [shape: f32[1,128], index: 2, kind: input, shape index: {}]   ;;  %s1295_s3 = inlined_call_operand.vmem [shape: f32[128,29], index: 3, kind: input, shape index: {}]   ;;  %s1296_s4 = inlined_call_operand.vmem [shape: f32[1,29], index: 4, kind: input, shape index: {}]   ;;  %s1297_s5 = inlined_call_operand.hbm [shape: f32[16,29], index: 5, kind: output, shape index: {}]  }
   0x1   :  { %v32_v0 = vld [vmem:[%s1293_s1 + $0x48] sm:$0xff]  ;;  %v31_v1 = vld [vmem:[%s1293_s1 + $0x40] sm:$0xff]  ;;  %v30_v2 = vld [vmem:[%s1293_s1 + $0x38] sm:$0xff] }
   0x2   :  { %v826_v3 = vand.u32 4294901760, %v32_v0  ;;  %v828_v4 = vand.u32 4294901760, %v31_v1  ;;  %v830_v5 = vand.u32 4294901760, %v30_v2  ;;  %v29_v6 = vld [vmem:[%s1293_s1 + $0x30] sm:$0xff]  ;;  %v28_v7 = vld [vmem:[%s1293_s1 + $0x28] sm:$0xff]  ;;  %v27_v8 = vld [vmem:[%s1293_s1 + $0x20] sm:$0xff] }
   0x3   :  { %v841_v9 = vand.u32 4294901760, %v29_v6  ;;  %v843_v10 = vand.u32 4294901760, %v28_v7  ;;  %v845_v11 = vand.u32 4294901760, %v27_v8  ;;  %v26_v12 = vld [vmem:[%s1293_s1 + $0x18] sm:$0xff]  ;;  %v25_v13 = vld [vmem:[%s1293_s1 + $0x10] sm:$0xff]  ;;  %v24_v21 = vld [vmem:[%s1293_s1 + $0x8] sm:$0xff] }
   0x4   :  { %51 = vmatpush.msra.mxu0 %v826_v3  ;;  %v855_v14 = vsub.f32 %v32_v0, %v826_v3  ;;  %v858_v15 = vsub.f32 %v31_v1, %v828_v4  ;;  %216 = vmatpush.msra.mxu3 %v826_v3  ;;  %v862_v16 = vsub.f32 %v30_v2, %v830_v5  ;;  %v864_v17 = vand.u32 4294901760, %v26_v12 }
   0x5   :  { %v867_v18 = vsub.f32 %v29_v6, %v841_v9  ;;  %v869_v19 = vand.u32 4294901760, %v25_v13  ;;  %v872_v20 = vsub.f32 %v28_v7, %v843_v10  ;;  %v883_v25 = vsub.f32 %v27_v8, %v845_v11 }
   0x6   :  { %53 = vmatpush.msra.mxu0 %v828_v4  ;;  %170 = vmatpush.msra.mxu2 %v855_v14  ;;  %v95_v22 = vand.u32 4294901760, %v855_v14  ;;  %v101_v23 = vand.u32 4294901760, %v858_v15  ;;  %v107_v24 = vand.u32 4294901760, %v862_v16 }
   0x7   :  { %10 = vsyncpa [#allocation3], 0  ;;  %218 = vmatpush.msra.mxu3 %v828_v4  ;;  %v113_v26 = vand.u32 4294901760, %v867_v18  ;;  %v119_v27 = vand.u32 4294901760, %v872_v20  ;;  %v23_v28 = vld [vmem:[%s1293_s1] sm:$0xff]  ;;  %v892_v29 = vsub.f32 %v26_v12, %v864_v17  ;;  %vm37_vm0 = vcmask 654336  }
   0x8   :  { %55 = vmatpush.msra.mxu0 %v830_v5  ;;  %v96_v30 = vsub.f32 %v855_v14, %v95_v22  ;;  %173 = vmatpush.msra.mxu2 %v858_v15  ;;  %v102_v31 = vsub.f32 %v858_v15, %v101_v23  ;;  %v108_v32 = vsub.f32 %v862_v16, %v107_v24  ;;  %v905_v33 = vand.u32 4294901760, %v24_v21  ;;  %v21_v34 = vld [vmem:[%s1292_s0] sm:$0xff]  ;;  %v22_v41 = vld [vmem:[%s1292_s0 + $0x8] sm:$0xff]  ;;  %v355_v14 = vld [vmem:[%s1295_s3 + $0x78] sm:$0xff]  ;;  %s741_s25 = sshll.u32 %s1297_s5, 4  ;;  %s785_s26 = smov 128   ;;  %s742_s25 = int_to_ptr.hbm [resolvable:$true] %s741_s25 }
   0x9   :  { %220 = vmatpush.msra.mxu3 %v830_v5  ;;  %v114_v35 = vsub.f32 %v867_v18, %v113_v26  ;;  %v125_v36 = vand.u32 4294901760, %v883_v25  ;;  %v917_v39 = vand.u32 4294901760, %v23_v28  ;;  %v920_v40 = vsub.f32 %v25_v13, %v869_v19  ;;  %s786_s27 = smov 8  }
   0xa   :  { %57 = vmatpush.msra.mxu0 %v841_v9  ;;  %v97_v37 = vand.u32 4294901760, %v96_v30  ;;  %v103_v38 = vand.u32 4294901760, %v102_v31  ;;  %176 = vmatpush.msra.mxu2 %v862_v16  ;;  %v120_v42 = vsub.f32 %v872_v20, %v119_v27  ;;  %v39_v43 = vsel %vm37_vm0, %v21_v34, 0  ;;  %v352_v31 = vld [vmem:[%s1295_s3 + $0x60] sm:$0xff]  ;;  %v350_v16 = vld [vmem:[%s1295_s3 + $0x50] sm:$0xff] }
   0xb   :  { %222 = vmatpush.msra.mxu3 %v841_v9  ;;  %v109_v44 = vand.u32 4294901760, %v108_v32  ;;  %v131_v45 = vand.u32 4294901760, %v892_v29  ;;  %v932_v46 = vand.u32 4294901760, %v39_v43  ;;  %v935_v47 = vsub.f32 %v24_v21, %v905_v33  ;;  %v351_v32 = vld [vmem:[%s1295_s3 + $0x58] sm:$0xff] }
   0xc   :  { %59 = vmatpush.msra.mxu0 %v843_v10  ;;  %98 = vmatpush.msra.mxu1 %v97_v37  ;;  %v115_v48 = vand.u32 4294901760, %v114_v35  ;;  %v126_v49 = vsub.f32 %v883_v25, %v125_v36  ;;  %v42_v50 = vsel %vm37_vm0, %v22_v41, 0  ;;  %v137_v52 = vand.u32 4294901760, %v920_v40 }
   0xd   :  { %179 = vmatpush.msra.mxu2 %v867_v18  ;;  %224 = vmatpush.msra.mxu3 %v843_v10  ;;  %v71_v51 = vsub.f32 %v39_v43, %v932_v46  ;;  %v947_v53 = vsub.f32 %v23_v28, %v917_v39  ;;  %v949_v54 = vand.u32 4294901760, %v42_v50  ;;  %v121_v55 = vand.u32 4294901760, %v120_v42  ;;  %v353_v28 = vld [vmem:[%s1295_s3 + $0x68] sm:$0xff]  ;;  %v348_v18 = vld [vmem:[%s1295_s3 + $0x40] sm:$0xff] }
   0xe   :  { %61 = vmatpush.msra.mxu0 %v845_v11  ;;  %104 = vmatpush.msra.mxu1 %v103_v38  ;;  %v132_v56 = vsub.f32 %v892_v29, %v131_v45  ;;  %v143_v58 = vand.u32 4294901760, %v935_v47  ;;  %v127_v60 = vand.u32 4294901760, %v126_v49  ;;  %v138_v62 = vsub.f32 %v920_v40, %v137_v52  ;;  %v349_v38 = vld [vmem:[%s1295_s3 + $0x48] sm:$0xff] }
   0xf   :  { %182 = vmatpush.msra.mxu2 %v872_v20  ;;  %226 = vmatpush.msra.mxu3 %v845_v11  ;;  %v72_v57 = vand.u32 4294901760, %v71_v51  ;;  %v959_v59 = vsub.f32 %v42_v50, %v949_v54  ;;  %v149_v63 = vand.u32 4294901760, %v947_v53  ;;  %v1002_v15 = vand.u32 4294901760, %v355_v14 }
  0x10   :  { %63 = vmatpush.msra.mxu0 %v864_v17  ;;  %110 = vmatpush.msra.mxu1 %v109_v44  ;;  %v133_v0 = vand.u32 4294901760, %v132_v56  ;;  %v144_v2 = vsub.f32 %v935_v47, %v143_v58  ;;  %v139_v7 = vand.u32 4294901760, %v138_v62  ;;  %v1006_v30 = vand.u32 4294901760, %v353_v28 }
  0x11   :  { %185 = vmatpush.msra.mxu2 %v883_v25  ;;  %228 = vmatpush.msra.mxu3 %v864_v17  ;;  %v73_v61 = vsub.f32 %v71_v51, %v72_v57  ;;  %v80_v6 = vand.u32 4294901760, %v959_v59  ;;  %v150_v8 = vsub.f32 %v947_v53, %v149_v63  ;;  %v1017_v34 = vand.u32 4294901760, %v352_v31 }
  0x12   :  { %65 = vmatpush.msra.mxu0 %v869_v19  ;;  %116 = vmatpush.msra.mxu1 %v115_v48  ;;  %v145_v12 = vand.u32 4294901760, %v144_v2  ;;  %v1019_v35 = vand.u32 4294901760, %v351_v32  ;;  %v1021_v37 = vand.u32 4294901760, %v350_v16  ;;  %v1029_v41 = vsub.f32 %v355_v14, %v1002_v15 }
  0x13   :  { %188 = vmatpush.msra.mxu2 %v892_v29  ;;  %230 = vmatpush.msra.mxu3 %v869_v19  ;;  %v74_v1 = vand.u32 4294901760, %v73_v61  ;;  %v81_v13 = vsub.f32 %v959_v59, %v80_v6  ;;  %v151_v21 = vand.u32 4294901760, %v150_v8  ;;  %v1035_v43 = vsub.f32 %v353_v28, %v1006_v30 }
  0x14   :  { %67 = vmatpush.msra.mxu0 %v905_v33  ;;  %122 = vmatpush.msra.mxu1 %v121_v55  ;;  %v1039_v44 = vsub.f32 %v352_v31, %v1017_v34  ;;  %v1042_v48 = vsub.f32 %v351_v32, %v1019_v35  ;;  %v1058_v56 = vsub.f32 %v350_v16, %v1021_v37  ;;  %v342_v16 = vld [vmem:[%s1295_s3 + $0x10] sm:$0xff]  ;;  %vm732_vm1 = vcmask 236544  }
  0x15   :  { %191 = vmatpush.msra.mxu2 %v920_v40  ;;  %232 = vmatpush.msra.mxu3 %v905_v33  ;;  %v423_v50 = vand.u32 4294901760, %v1035_v43 }
  0x16   :  { %69 = vmatpush.msra.mxu0 %v917_v39  ;;  %128 = vmatpush.msra.mxu1 %v127_v60  ;;  %v429_v55 = vand.u32 4294901760, %v1039_v44  ;;  %v435_v25 = vand.u32 4294901760, %v1042_v48  ;;  %v441_v62 = vand.u32 4294901760, %v1058_v56 }
  0x17   :  { %194 = vmatpush.msra.mxu2 %v935_v47  ;;  %75 = vmatmul.f32.vlgmr.msra.gmra.mxu0 %v74_v1 }
  0x18   :  { %257 = vmatpush.msrb.mxu0 %v95_v22  ;;  %134 = vmatpush.msra.mxu1 %v133_v0  ;;  %v354_v22 = vld [vmem:[%s1295_s3 + $0x70] sm:$0xff]  ;;  %v430_v61 = vsub.f32 %v1039_v44, %v429_v55 }
  0x19   :  { %197 = vmatpush.msra.mxu2 %v947_v53  ;;  %234 = vmatpush.msra.mxu3 %v917_v39 }
  0x1a   :  { %261 = vmatpush.msrb.mxu0 %v101_v23  ;;  %140 = vmatpush.msra.mxu1 %v139_v7  ;;  %v1004_v23 = vand.u32 4294901760, %v354_v22 }
  0x1b   :  { %200 = vmatmul.f32.vlgmr.msra.gmra.mxu2 %v71_v51  ;;  %238 = vmatmul.f32.vlgmr.msra.gmra.mxu3 %v72_v57  ;;  %v1053_v51 = vand.u32 4294901760, %v349_v38  ;;  %v424_v57 = vsub.f32 %v1035_v43, %v423_v50 }
  0x1c   :  { %265 = vmatpush.msrb.mxu0 %v107_v24  ;;  %146 = vmatpush.msra.mxu1 %v145_v12  ;;  %v82_v24 = vand.u32 4294901760, %v81_v13  ;;  %v1032_v42 = vsub.f32 %v354_v22, %v1004_v23 }
  0x1d   :  { %361 = vmatpush.msrb.mxu2 %v1002_v15  ;;  %v425_v29 = vand.u32 4294901760, %v424_v57  ;;  %v341_v57 = vld [vmem:[%s1295_s3 + $0x8] sm:$0xff] }
  0x1e   :  { %269 = vmatpush.msrb.mxu0 %v113_v26  ;;  %152 = vmatpush.msra.mxu1 %v151_v21  ;;  %v411_v26 = vand.u32 4294901760, %v1029_v41  ;;  %v417_v49 = vand.u32 4294901760, %v1032_v42  ;;  %v343_v21 = vld [vmem:[%s1295_s3 + $0x18] sm:$0xff] }
  0x1f   :  { %83 = vmatmul.f32.gmra.mxu0 %v82_v24  ;;  %154 = vmatmul.f32.vlgmr.msra.gmra.mxu1 %v932_v46  ;;  %v1200_v32 = vand.u32 4294901760, %v343_v21 }
  0x20   :  { %273 = vmatpush.msrb.mxu0 %v119_v27  ;;  %310 = vmatpush.msrb.mxu1 %v826_v3  ;;  %v412_v3 = vsub.f32 %v1029_v41, %v411_v26  ;;  %v418_v20 = vsub.f32 %v1032_v42, %v417_v49  ;;  %v1069_v27 = vand.u32 4294901760, %v348_v18 }
  0x21   :  { %363 = vmatpush.msrb.mxu2 %v1004_v23 }
  0x22   :  { %277 = vmatpush.msrb.mxu0 %v125_v36  ;;  %312 = vmatpush.msrb.mxu1 %v828_v4  ;;  %v413_v4 = vand.u32 4294901760, %v412_v3  ;;  %v1080_v36 = vsub.f32 %v349_v38, %v1053_v51  ;;  %v419_v60 = vand.u32 4294901760, %v418_v20  ;;  %v1210_v3 = vand.u32 4294901760, %v342_v16 }
  0x23   :  { %205 = vmatmul.f32.gmra.mxu2 %v959_v59  ;;  %244 = vmatmul.f32.gmra.mxu3 %v80_v6  ;;  %v344_v6 = vld [vmem:[%s1295_s3 + $0x20] sm:$0xff]  ;;  %v1214_v20 = vsub.f32 %v343_v21, %v1200_v32 }
  0x24   :  { %281 = vmatpush.msrb.mxu0 %v131_v45  ;;  %314 = vmatpush.msrb.mxu1 %v830_v5  ;;  %v1093_v5 = vsub.f32 %v348_v18, %v1069_v27  ;;  %v436_v45 = vsub.f32 %v1042_v48, %v435_v25  ;;  %v447_v40 = vand.u32 4294901760, %v1080_v36  ;;  %v1183_v13 = vand.u32 4294901760, %v344_v6 }
  0x25   :  { %414 = vmatpush.msrb.mxu3 %v413_v4  ;;  %365 = vmatpush.msrb.mxu2 %v1006_v30 }
  0x26   :  { %285 = vmatpush.msrb.mxu0 %v137_v52  ;;  %316 = vmatpush.msrb.mxu1 %v841_v9  ;;  %v431_v9 = vand.u32 4294901760, %v430_v61  ;;  %v442_v52 = vsub.f32 %v1058_v56, %v441_v62  ;;  %v453_v47 = vand.u32 4294901760, %v1093_v5  ;;  %v1196_v31 = vsub.f32 %v344_v6, %v1183_v13 }
  0x27   :  { %158 = vmatmul.f32.gmra.mxu1 %v949_v54  ;;  %420 = vmatpush.msrb.mxu3 %v419_v60  ;;  %v488_v61 = vsub.f32 %v342_v16, %v1210_v3 }
  0x28   :  { %289 = vmatpush.msrb.mxu0 %v143_v58  ;;  %318 = vmatpush.msrb.mxu1 %v843_v10  ;;  %v437_v10 = vand.u32 4294901760, %v436_v45  ;;  %v448_v58 = vsub.f32 %v1080_v36, %v447_v40  ;;  %v443_v59 = vand.u32 4294901760, %v442_v52  ;;  %v477_v18 = vand.u32 4294901760, %v1196_v31 }
  0x29   :  { %426 = vmatpush.msrb.mxu3 %v425_v29  ;;  %367 = vmatpush.msrb.mxu2 %v1017_v34  ;;  %v1225_v29 = vand.u32 4294901760, %v341_v57  ;;  %v483_v45 = vand.u32 4294901760, %v1214_v20 }
  0x2a   :  { %293 = vmatpush.msrb.mxu0 %v149_v63  ;;  %320 = vmatpush.msrb.mxu1 %v845_v11  ;;  %v454_v11 = vsub.f32 %v1093_v5, %v453_v47  ;;  %v345_v63 = vld [vmem:[%s1295_s3 + $0x28] sm:$0xff]  ;;  %v478_v60 = vsub.f32 %v1196_v31, %v477_v18 }
  0x2b   :  { %295 = vmatmul.f32.vlgmr.msrb.gmra.mxu0 %v932_v46  ;;  %432 = vmatpush.msrb.mxu3 %v431_v9  ;;  %v1168_v2 = vand.u32 4294901760, %v345_v63  ;;  %v340_v9 = vld [vmem:[%s1295_s3] sm:$0xff] }
  0x2c   :  { %322 = vmatpush.msrb.mxu1 %v864_v17  ;;  %516 = vmatpush.msra.mxu0 %v1029_v41  ;;  %v449_v17 = vand.u32 4294901760, %v448_v58  ;;  %v479_v52 = vand.u32 4294901760, %v478_v60  ;;  %v494_v58 = vsub.f32 %v341_v57, %v1225_v29 }
  0x2d   :  { %369 = vmatpush.msrb.mxu2 %v1019_v35  ;;  %438 = vmatpush.msrb.mxu3 %v437_v10  ;;  %v1181_v12 = vsub.f32 %v345_v63, %v1168_v2  ;;  %v489_v10 = vand.u32 4294901760, %v488_v61 }
  0x2e   :  { %324 = vmatpush.msrb.mxu1 %v869_v19  ;;  %519 = vmatpush.msra.mxu0 %v1032_v42  ;;  %v455_v19 = vand.u32 4294901760, %v454_v11  ;;  %v484_v11 = vsub.f32 %v1214_v20, %v483_v45 }
  0x2f   :  { %371 = vmatpush.msrb.mxu2 %v1021_v37  ;;  %444 = vmatpush.msrb.mxu3 %v443_v59  ;;  %v471_v28 = vand.u32 4294901760, %v1181_v12  ;;  %v1234_v59 = vand.u32 4294901760, %v340_v9 }
  0x30   :  { %326 = vmatpush.msrb.mxu1 %v905_v33  ;;  %522 = vmatpush.msra.mxu0 %v1035_v43  ;;  %v347_v33 = vld [vmem:[%s1295_s3 + $0x38] sm:$0xff] }
  0x31   :  { %373 = vmatpush.msrb.mxu2 %v1053_v51  ;;  %450 = vmatpush.msrb.mxu3 %v449_v17  ;;  %v472_v38 = vsub.f32 %v1181_v12, %v471_v28  ;;  %v490_v17 = vsub.f32 %v488_v61, %v489_v10 }
  0x32   :  { %328 = vmatpush.msrb.mxu1 %v917_v39  ;;  %525 = vmatpush.msra.mxu0 %v1039_v44  ;;  %v1149_v39 = vand.u32 4294901760, %v347_v33 }
  0x33   :  { %299 = vmatmul.f32.gmra.mxu0 %v949_v54  ;;  %330 = vmatmul.f32.vlgmr.msrb.gmra.mxu1 %v932_v46  ;;  %v346_v46 = vld [vmem:[%s1295_s3 + $0x30] sm:$0xff]  ;;  %v473_v4 = vand.u32 4294901760, %v472_v38  ;;  %v491_v63 = vand.u32 4294901760, %v490_v17  ;;  %v757_v38 = vld [vmem:[%s1296_s4] ss:$0 sm:$0xff]  ;;  %s784_s4 = smov [#allocation2]  }
  0x34   :  { %574 = vmatpush.msra.mxu1 %v1002_v15  ;;  %375 = vmatpush.msrb.mxu2 %v1069_v27  ;;  %v1155_v53 = vsub.f32 %v347_v33, %v1149_v39  ;;  %v500_v33 = vsub.f32 %v340_v9, %v1234_v59  ;;  %s739_s22 = sshll.u32 %s784_s4, 4  ;;  %s740_s22 = int_to_ptr.vmem [resolvable:$true] %s739_s22 }
  0x35   :  { %456 = vmatpush.msrb.mxu3 %v455_v19  ;;  %528 = vmatpush.msra.mxu0 %v1042_v48  ;;  %v495_v19 = vand.u32 4294901760, %v494_v58 }
  0x36   :  { %576 = vmatpush.msra.mxu1 %v1004_v23  ;;  %377 = vmatpush.msrb.mxu2 %v1149_v39  ;;  %v459_v0 = vand.u32 4294901760, %v1155_v53 }
  0x37   :  { %531 = vmatpush.msra.mxu0 %v1058_v56  ;;  %v496_v6 = vsub.f32 %v494_v58, %v495_v19 }
  0x38   :  { %578 = vmatpush.msra.mxu1 %v1006_v30  ;;  %v460_v7 = vsub.f32 %v1155_v53, %v459_v0 }
  0x39   :  { %534 = vmatpush.msra.mxu0 %v1080_v36  ;;  %v497_v21 = vand.u32 4294901760, %v496_v6 }
  0x3a   :  { %580 = vmatpush.msra.mxu1 %v1017_v34  ;;  %v461_v14 = vand.u32 4294901760, %v460_v7  ;;  %v501_v7 = vand.u32 4294901760, %v500_v33 }
  0x3b   :  { %334 = vmatmul.f32.gmra.mxu1 %v949_v54  ;;  %537 = vmatpush.msra.mxu0 %v1093_v5  ;;  %v1157_v54 = vand.u32 4294901760, %v346_v46 }
  0x3c   :  { %582 = vmatpush.msra.mxu1 %v1019_v35  ;;  %462 = vmatpush.msrb.mxu3 %v461_v14  ;;  %v502_v14 = vsub.f32 %v500_v33, %v501_v7 }
  0x3d   :  { %v1166_v1 = vsub.f32 %v346_v46, %v1157_v54  ;;  %379 = vmatpush.msrb.mxu2 %v1157_v54  ;;  %540 = vmatpush.msra.mxu0 %v1155_v53  ;;  %v485_v46 = vand.u32 4294901760, %v484_v11 }
  0x3e   :  { %584 = vmatpush.msra.mxu1 %v1021_v37 }
  0x3f   :  { %v465_v8 = vand.u32 4294901760, %v1166_v1  ;;  %381 = vmatpush.msrb.mxu2 %v1168_v2  ;;  %543 = vmatpush.msra.mxu0 %v1166_v1 }
  0x40   :  { %586 = vmatpush.msra.mxu1 %v1053_v51 }
  0x41   :  { %v466_v22 = vsub.f32 %v1166_v1, %v465_v8  ;;  %383 = vmatpush.msrb.mxu2 %v1183_v13  ;;  %546 = vmatpush.msra.mxu0 %v1181_v12 }
  0x42   :  { %588 = vmatpush.msra.mxu1 %v1069_v27 }
  0x43   :  { %v467_v24 = vand.u32 4294901760, %v466_v22  ;;  %549 = vmatpush.msra.mxu0 %v1196_v31  ;;  %385 = vmatpush.msrb.mxu2 %v1200_v32  ;;  %v503_v22 = vand.u32 4294901760, %v502_v14 }
  0x44   :  { %590 = vmatpush.msra.mxu1 %v1149_v39 }
  0x45   :  { %468 = vmatpush.msrb.mxu3 %v467_v24  ;;  %387 = vmatpush.msrb.mxu2 %v1210_v3 }
  0x46   :  { %592 = vmatpush.msra.mxu1 %v1157_v54  ;;  %552 = vmatpush.msra.mxu0 %v1214_v20 }
  0x47   :  { %474 = vmatpush.msrb.mxu3 %v473_v4  ;;  %389 = vmatpush.msrb.mxu2 %v1225_v29 }
  0x48   :  { %594 = vmatpush.msra.mxu1 %v1168_v2  ;;  %555 = vmatpush.msra.mxu0 %v488_v61 }
  0x49   :  { %480 = vmatpush.msrb.mxu3 %v479_v52  ;;  %391 = vmatpush.msrb.mxu2 %v1234_v59 }
  0x4a   :  { %596 = vmatpush.msra.mxu1 %v1183_v13  ;;  %558 = vmatpush.msra.mxu0 %v494_v58 }
  0x4b   :  { %621 = vmatpush.msra.mxu2 %v411_v26  ;;  %486 = vmatpush.msrb.mxu3 %v485_v46 }
  0x4c   :  { %598 = vmatpush.msra.mxu1 %v1200_v32  ;;  %561 = vmatpush.msra.mxu0 %v500_v33 }
  0x4d   :  { %625 = vmatpush.msra.mxu2 %v417_v49  ;;  %492 = vmatpush.msrb.mxu3 %v491_v63 }
  0x4e   :  { %600 = vmatpush.msra.mxu1 %v1210_v3 }
  0x4f   :  { %629 = vmatpush.msra.mxu2 %v423_v50  ;;  %498 = vmatpush.msrb.mxu3 %v497_v21 }
  0x50   :  { %602 = vmatpush.msra.mxu1 %v1225_v29 }
  0x51   :  { %633 = vmatpush.msra.mxu2 %v429_v55  ;;  %504 = vmatpush.msrb.mxu3 %v503_v22 }
  0x52   :  { %604 = vmatpush.msra.mxu1 %v1234_v59 }
  0x53   :  { %692 = vmatpush.msra.mxu3 %v1002_v15  ;;  %637 = vmatpush.msra.mxu2 %v435_v25 }
  0x55   :  { %694 = vmatpush.msra.mxu3 %v1004_v23  ;;  %641 = vmatpush.msra.mxu2 %v441_v62  ;;  %v756_v23 = vld [vmem:[%s1294_s2] ss:$0 sm:$0xff] }
  0x57   :  { %696 = vmatpush.msra.mxu3 %v1006_v30  ;;  %645 = vmatpush.msra.mxu2 %v447_v40 }
  0x59   :  { %698 = vmatpush.msra.mxu3 %v1017_v34  ;;  %649 = vmatpush.msra.mxu2 %v453_v47 }
  0x5b   :  { %700 = vmatpush.msra.mxu3 %v1019_v35  ;;  %653 = vmatpush.msra.mxu2 %v459_v0 }
  0x5d   :  { %702 = vmatpush.msra.mxu3 %v1021_v37  ;;  %657 = vmatpush.msra.mxu2 %v465_v8 }
  0x5f   :  { %704 = vmatpush.msra.mxu3 %v1053_v51  ;;  %661 = vmatpush.msra.mxu2 %v471_v28 }
  0x61   :  { %706 = vmatpush.msra.mxu3 %v1069_v27  ;;  %665 = vmatpush.msra.mxu2 %v477_v18 }
  0x63   :  { %708 = vmatpush.msra.mxu3 %v1149_v39  ;;  %669 = vmatpush.msra.mxu2 %v483_v45 }
  0x65   :  { %710 = vmatpush.msra.mxu3 %v1157_v54  ;;  %673 = vmatpush.msra.mxu2 %v489_v10 }
  0x67   :  { %712 = vmatpush.msra.mxu3 %v1168_v2  ;;  %677 = vmatpush.msra.mxu2 %v495_v19 }
  0x69   :  { %714 = vmatpush.msra.mxu3 %v1183_v13  ;;  %681 = vmatpush.msra.mxu2 %v501_v7 }
  0x6b   :  { %716 = vmatpush.msra.mxu3 %v1200_v32 }
  0x6d   :  { %718 = vmatpush.msra.mxu3 %v1210_v3 }
  0x6f   :  { %720 = vmatpush.msra.mxu3 %v1225_v29 }
  0x71   :  { %722 = vmatpush.msra.mxu3 %v1234_v59 }
  0x94   :  { %v76_v15 = vpop.f32.mrf.mxu0 }
  0x95   :  { %v77_v35 = vadd.f32 %v756_v23, %v76_v15 }
  0x9c   :  { %v155_v30 = vpop.f32.mrf.mxu1  ;;  %v84_v34 = vpop.f32.mrf.mxu0 }
  0x9d   :  { %v156_v41 = vadd.f32 %v155_v30, %v77_v35  ;;  %v85_v44 = vadd.f32 %v756_v23, %v84_v34 }
  0x9e   :  { %v201_v37 = vpop.f32.mrf.mxu2  ;;  %v239_v43 = vpop.f32.mrf.mxu3 }
  0x9f   :  { %v202_v48 = vadd.f32 %v201_v37, %v156_v41 }
  0xa1   :  { %v240_v49 = vadd.f32 %v239_v43, %v202_v48 }
  0xa4   :  { %v159_v42 = vpop.f32.mrf.mxu1 }
  0xa5   :  { %v160_v50 = vadd.f32 %v159_v42, %v85_v44 }
  0xa6   :  { %v206_v51 = vpop.f32.mrf.mxu2  ;;  %v245_v36 = vpop.f32.mrf.mxu3 }
  0xa7   :  { %v207_v27 = vadd.f32 %v206_v51, %v160_v50 }
  0xa8   :  { %v296_v26 = vpop.f32.mrf.mxu0 }
  0xa9   :  { %v297_v55 = vadd.f32 %v296_v26, %v240_v49  ;;  %v246_v40 = vadd.f32 %v245_v36, %v207_v27 }
  0xb0   :  { %v331_v56 = vpop.f32.mrf.mxu1  ;;  %v300_v5 = vpop.f32.mrf.mxu0 }
  0xb1   :  { %v332_v25 = vadd.f32 %v331_v56, %v297_v55  ;;  %v301_v39 = vadd.f32 %v300_v5, %v246_v40 }
  0xb3   :  { %v338_v62 = vmax.f32 %v332_v25, 0.0 }
  0xb5   :  { %v392_v47 = vand.u32 4294901760, %v338_v62 }
  0xb7   :  { %v393_v53 = vsub.f32 %v338_v62, %v392_v47  ;;  %506 = vmatmul.f32.vlgmr.msrb.gmra.mxu3 %v392_v47 }
  0xb8   :  { %v335_v54 = vpop.f32.mrf.mxu1 }
  0xb9   :  { %v336_v0 = vadd.f32 %v335_v54, %v301_v39  ;;  %564 = vmatmul.f32.vlgmr.msra.gmra.mxu0 %v393_v53  ;;  %v394_v1 = vand.u32 4294901760, %v393_v53 }
  0xbb   :  { %v339_v2 = vmax.f32 %v336_v0, 0.0  ;;  %608 = vmatmul.f32.vlgmr.msra.gmra.mxu1 %v394_v1  ;;  %v395_v8 = vsub.f32 %v393_v53, %v394_v1 }
  0xbd   :  { %v400_v12 = vand.u32 4294901760, %v339_v2  ;;  %v396_v13 = vand.u32 4294901760, %v395_v8 }
  0xbf   :  { %v401_v28 = vsub.f32 %v339_v2, %v400_v12  ;;  %397 = vmatmul.f32.vlgmr.msrb.gmra.mxu2 %v396_v13  ;;  %510 = vmatmul.f32.gmra.mxu3 %v400_v12 }
  0xc1   :  { %569 = vmatmul.f32.gmra.mxu0 %v401_v28  ;;  %v402_v31 = vand.u32 4294901760, %v401_v28 }
  0xc3   :  { %614 = vmatmul.f32.gmra.mxu1 %v402_v31  ;;  %v403_v32 = vsub.f32 %v401_v28, %v402_v31 }
  0xc5   :  { %v404_v16 = vand.u32 4294901760, %v403_v32 }
  0xc7   :  { %405 = vmatmul.f32.gmra.mxu2 %v404_v16  ;;  %724 = vmatmul.f32.vlgmr.msra.gmra.mxu3 %v392_v47 }
  0xcf   :  { %683 = vmatmul.f32.vlgmr.msra.gmra.mxu2 %v392_v47  ;;  %728 = vmatmul.f32.gmra.mxu3 %v400_v12 }
  0xd7   :  { %687 = vmatmul.f32.gmra.mxu2 %v400_v12 }
 0x136   :  { %v565_v4 = vpop.f32.mrf.mxu0 }
 0x138   :  { %v609_v45 = vpop.f32.mrf.mxu1 }
 0x13a   :  { %v507_v24 = vpop.f32.mrf.mxu3 }
 0x13e   :  { %v570_v11 = vpop.f32.mrf.mxu0 }
 0x140   :  { %v615_v33 = vpop.f32.mrf.mxu1 }
 0x142   :  { %v398_v18 = vpop.f32.mrf.mxu2  ;;  %v511_v20 = vpop.f32.mrf.mxu3 }
 0x143   :  { %v399_v3 = vadd.f32 %v757_v38, %v398_v18 }
 0x145   :  { %v508_v57 = vadd.f32 %v507_v24, %v399_v3 }
 0x147   :  { %v566_v29 = vadd.f32 %v565_v4, %v508_v57 }
 0x149   :  { %v610_v52 = vadd.f32 %v609_v45, %v566_v29 }
 0x14a   :  { %v406_v60 = vpop.f32.mrf.mxu2  ;;  %v725_v10 = vpop.f32.mrf.mxu3 }
 0x14b   :  { %v407_v61 = vadd.f32 %v757_v38, %v406_v60 }
 0x14d   :  { %v512_v9 = vadd.f32 %v511_v20, %v407_v61 }
 0x14f   :  { %v571_v19 = vadd.f32 %v570_v11, %v512_v9 }
 0x151   :  { %v616_v46 = vadd.f32 %v615_v33, %v571_v19 }
 0x152   :  { %v684_v58 = vpop.f32.mrf.mxu2  ;;  %v729_v7 = vpop.f32.mrf.mxu3 }
 0x153   :  { %v685_v59 = vadd.f32 %v684_v58, %v610_v52 }
 0x155   :  { %v726_v17 = vadd.f32 %v725_v10, %v685_v59 }
 0x157   :  { %733 = vst.msk [vmem:[#allocation2] sm:$0xff] %vm732_vm1, %v726_v17 }
 0x15a   :  { %v688_v63 = vpop.f32.mrf.mxu2 }
 0x15b   :  { %v689_v6 = vadd.f32 %v688_v63, %v616_v46 }
 0x15d   :  { %v730_v21 = vadd.f32 %v729_v7, %v689_v6 }
 0x15f   :  { %734 = vst.msk [vmem:[#allocation2 + $0x8] sm:$0xff] %vm732_vm1, %v730_v21 }
 0x160   :  { %747 = dma.vmem_to_hbm [thread:$0]  %s740_s22, 256, %s742_s25, [#allocation3], %s785_s26, %s785_s26, %s786_s27  }
 0x161   :  { %782 = dma.done.wait [#allocation3], 256  }
 0x162   :  { %783 = vsyncadd [#allocation3], 4294967040 }
 0x163   :  { %752 = vsyncpa [#allocation3], 1 }

</bundles_post_ra>
